<compile_context>
chip_gen: v7x
topology: tpu7x:2x2x1
jax: 0.10.0
libtpu: 0.0.40
codegen_flags: <defaults>
</compile_context>

<pallas_src>
import functools

import jax
import jax.numpy as jnp
from jax.experimental import pallas as pl
from jax.experimental.pallas import tpu as pltpu

LANE = 128  # pad final output features to a full lane width


# ----------------------------------------------------------------------------
# Kernel
# ----------------------------------------------------------------------------
def mlp_kernel(
    x_ref,
    w1_ref, b1_ref,
    w2_ref, b2_ref,
    w3_ref, b3_ref,
    w4_ref, b4_ref,
    w5_ref, b5_ref,
    o_ref,
):
    def layer(h, w_ref, b_ref, relu=True):
        # Matmul in the weight dtype (bf16) on the MXU, f32 accumulation;
        # bias add + ReLU stay in f32 on the VPU.
        y = jnp.dot(
            h.astype(w_ref.dtype), w_ref[...],
            preferred_element_type=jnp.float32,
        ) + b_ref[...]
        return jnp.maximum(y, 0.0) if relu else y

    h = x_ref[...]
    h = layer(h, w1_ref, b1_ref)          # fc1 (+bn1 folded) + relu
    h = layer(h, w2_ref, b2_ref)          # fc2 (+bn2 folded) + relu
    h = layer(h, w3_ref, b3_ref)          # fc3 (+bn3 folded) + relu
    h = layer(h, w4_ref, b4_ref)          # fc4 (+bn4 folded) + relu
    out = layer(h, w5_ref, b5_ref, relu=False)  # fc5 (padded to 128 lanes)
    o_ref[...] = out.astype(o_ref.dtype)


# ----------------------------------------------------------------------------
# Wrapper
# ----------------------------------------------------------------------------
@functools.partial(jax.jit, static_argnames=("num_classes", "tile_b"))
def mlp_forward(x, params, *, num_classes, tile_b=256):
    """params: flat tuple (w1,b1, w2,b2, ..., w5,b5), BN already folded in.

    Weights wi are (D_in, D_out) (final layer padded to LANE output columns),
    biases bi are (1, D_out) float32 row vectors.
    """
    B, D = x.shape
    out_w = params[-1].shape[-1]          # padded output width (LANE)

    tile = min(tile_b, B)
    grid = (pl.cdiv(B, tile),)            # partial tail block handled by Pallas

    x_in = x.astype(params[0].dtype)      # bf16 matmul operand

    x_spec = pl.BlockSpec((tile, D), lambda i: (i, 0))
    # NOTE: bind ndim explicitly so the lambda does not capture the loop var.
    param_specs = [
        pl.BlockSpec(p.shape, lambda i, nd=p.ndim: (0,) * nd) for p in params
    ]
    out_spec = pl.BlockSpec((tile, out_w), lambda i: (i, 0))

    flops = 2 * B * sum(w.shape[0] * w.shape[1] for w in params[0::2])
    bytes_accessed = (
        x_in.size * x_in.dtype.itemsize
        + B * out_w * 4
        + sum(p.size * p.dtype.itemsize for p in params)
    )

    out = pl.pallas_call(
        mlp_kernel,
        out_shape=jax.ShapeDtypeStruct((B, out_w), jnp.float32),
        grid_spec=pltpu.PrefetchScalarGridSpec(
            num_scalar_prefetch=0,
            grid=grid,
            in_specs=[x_spec] + param_specs,
            out_specs=out_spec,
        ),
        compiler_params=pltpu.CompilerParams(
            dimension_semantics=("parallel",),
        ),
        cost_estimate=pl.CostEstimate(
            flops=flops, transcendentals=0, bytes_accessed=bytes_accessed
        ),
    )(x_in, *params)

    return out[:, :num_classes]


# ----------------------------------------------------------------------------
# Parameter construction (mirrors the PyTorch module shapes)
# ----------------------------------------------------------------------------
def init_raw_params(key, input_size, num_classes):
    """Per-layer (w, b, bn) with bn = (gamma, beta, running_mean, running_var)."""
    dims = [input_size, 32, 64, 32, 16, num_classes]
    layers = []
    for li in range(5):
        d_in, d_out = dims[li], dims[li + 1]
        key, kw, kb, kg, kbeta, km, kv = jax.random.split(key, 7)
        bound = 1.0 / jnp.sqrt(jnp.float32(d_in))
        w = jax.random.uniform(kw, (d_in, d_out), jnp.float32, -bound, bound)
        b = jax.random.uniform(kb, (1, d_out), jnp.float32, -bound, bound)
        bn = None
        if li < 4:  # BatchNorm1d after fc1..fc4
            gamma = 1.0 + 0.1 * jax.random.normal(kg, (1, d_out), jnp.float32)
            beta = 0.1 * jax.random.normal(kbeta, (1, d_out), jnp.float32)
            mean = 0.1 * jax.random.normal(km, (1, d_out), jnp.float32)
            var = jnp.abs(1.0 + 0.1 * jax.random.normal(kv, (1, d_out), jnp.float32))
            bn = (gamma, beta, mean, var)
        layers.append((w, b, bn))
    return layers


def fold_params(layers, *, eps=1e-5, out_pad=LANE, weight_dtype=jnp.bfloat16):
    """Fold eval-mode BN into (W, b); pad the final layer to out_pad lanes."""
    flat = []
    n = len(layers)
    for li, (w, b, bn) in enumerate(layers):
        if bn is not None:
            gamma, beta, mean, var = bn
            scale = gamma / jnp.sqrt(var + eps)       # (1, d_out)
            shift = beta - mean * scale
            w = w * scale                             # scale each output column
            b = b * scale + shift
        if li == n - 1 and out_pad is not None and w.shape[1] < out_pad:
            pad = out_pad - w.shape[1]
            w = jnp.pad(w, ((0, 0), (0, pad)))
            b = jnp.pad(b, ((0, 0), (0, pad)))
        flat += [w.astype(weight_dtype), b.astype(jnp.float32)]
    return tuple(flat)


# ----------------------------------------------------------------------------
# Pure-JAX references
# ----------------------------------------------------------------------------
def mlp_reference_folded(x, params):
    """Same math as the kernel (folded params, same matmul dtype path)."""
    h = x
    n_layers = len(params) // 2
    for li in range(n_layers):
        w, b = params[2 * li], params[2 * li + 1]
        h = jnp.dot(h.astype(w.dtype), w, preferred_element_type=jnp.float32) + b
        if li < n_layers - 1:
            h = jnp.maximum(h, 0.0)
    return h


def mlp_reference_unfolded(x, layers, eps=1e-5):
    """Direct eval-mode forward of the original module (all f32)."""
    h = x
    for w, b, bn in layers:
        h = h @ w + b
        if bn is not None:
            gamma, beta, mean, var = bn
            h = (h - mean) / jnp.sqrt(var + eps) * gamma + beta
            h = jnp.maximum(h, 0.0)
    return h


# ----------------------------------------------------------------------------
# Demo / correctness check
# ----------------------------------------------------------------------------
if __name__ == "__main__":
    key = jax.random.PRNGKey(0)
    batch, input_size, num_classes = 512, 16, 8
    tile_b = 256  # multiple of 256 (v7x) and 128 (v5e); grid = (2,)

    kx, kp = jax.random.split(key)
    x = jax.random.normal(kx, (batch, input_size), jnp.float32)
    layers = init_raw_params(kp, input_size, num_classes)

    # 1) Validate the BN fold itself in pure f32 JAX (no padding, no bf16).
    folded_f32 = fold_params(layers, out_pad=None, weight_dtype=jnp.float32)
    ref_unfolded = mlp_reference_unfolded(x, layers)
    ref_folded_f32 = mlp_reference_folded(x, folded_f32)
    assert jnp.allclose(ref_folded_f32, ref_unfolded, atol=1e-4, rtol=1e-4), \
        "BN fold mismatch"

    # 2) Kernel vs matched-precision (bf16 matmul) folded reference.
    params = fold_params(layers, out_pad=LANE, weight_dtype=jnp.bfloat16)
    out = mlp_forward(x, params, num_classes=num_classes, tile_b=tile_b)
    out = jax.block_until_ready(out)

    ref = mlp_reference_folded(x, params)[:, :num_classes]
    assert out.shape == (batch, num_classes)
    assert jnp.allclose(out, ref, atol=1e-3, rtol=1e-3), "mismatch vs reference"

    print("KERNEL_OK")
</pallas_src>

<mosaic_0001>
module attributes {stable_mosaic.version = 11 : i64} {
  func.func @mlp_kernel(%arg0: i32, %arg1: memref<256x16xbf16, #tpu.memory_space<vmem>>, %arg2: memref<16x32xbf16, #tpu.memory_space<vmem>>, %arg3: memref<1x32xf32, #tpu.memory_space<vmem>>, %arg4: memref<32x64xbf16, #tpu.memory_space<vmem>>, %arg5: memref<1x64xf32, #tpu.memory_space<vmem>>, %arg6: memref<64x32xbf16, #tpu.memory_space<vmem>>, %arg7: memref<1x32xf32, #tpu.memory_space<vmem>>, %arg8: memref<32x16xbf16, #tpu.memory_space<vmem>>, %arg9: memref<1x16xf32, #tpu.memory_space<vmem>>, %arg10: memref<16x128xbf16, #tpu.memory_space<vmem>>, %arg11: memref<1x128xf32, #tpu.memory_space<vmem>>, %arg12: memref<256x128xf32, #tpu.memory_space<vmem>>) attributes {dimension_semantics = [#tpu.dimension_semantics<parallel>], iteration_bounds = array<i64: 2>, scalar_prefetch = 0 : i64, scratch_operands = 0 : i64, tpu.core_type = #tpu.core_type<tc>, window_params = [{transform_indices = @transform_0, window_bounds = array<i64: 256, 16>}, {pipeline_mode = #tpu.pipeline_mode<synchronous>, transform_indices = @transform_1, window_bounds = array<i64: 16, 32>}, {pipeline_mode = #tpu.pipeline_mode<synchronous>, transform_indices = @transform_2, window_bounds = array<i64: 1, 32>}, {pipeline_mode = #tpu.pipeline_mode<synchronous>, transform_indices = @transform_3, window_bounds = array<i64: 32, 64>}, {pipeline_mode = #tpu.pipeline_mode<synchronous>, transform_indices = @transform_4, window_bounds = array<i64: 1, 64>}, {pipeline_mode = #tpu.pipeline_mode<synchronous>, transform_indices = @transform_5, window_bounds = array<i64: 64, 32>}, {pipeline_mode = #tpu.pipeline_mode<synchronous>, transform_indices = @transform_6, window_bounds = array<i64: 1, 32>}, {pipeline_mode = #tpu.pipeline_mode<synchronous>, transform_indices = @transform_7, window_bounds = array<i64: 32, 16>}, {pipeline_mode = #tpu.pipeline_mode<synchronous>, transform_indices = @transform_8, window_bounds = array<i64: 1, 16>}, {pipeline_mode = #tpu.pipeline_mode<synchronous>, transform_indices = @transform_9, window_bounds = array<i64: 16, 128>}, {pipeline_mode = #tpu.pipeline_mode<synchronous>, transform_indices = @transform_10, window_bounds = array<i64: 1, 128>}, {transform_indices = @transform_11, window_bounds = array<i64: 256, 128>}]} {
    %c0 = arith.constant 0 : index
    %c0_0 = arith.constant 0 : index
    %0 = vector.load %arg1[%c0, %c0_0] : memref<256x16xbf16, #tpu.memory_space<vmem>>, vector<256x16xbf16>
    %c0_1 = arith.constant 0 : index
    %c0_2 = arith.constant 0 : index
    %1 = vector.load %arg2[%c0_1, %c0_2] : memref<16x32xbf16, #tpu.memory_space<vmem>>, vector<16x32xbf16>
    %cst = arith.constant dense<0.000000e+00> : vector<256x32xf32>
    %2 = tpu.matmul %0, %1, %cst {dimension_numbers = #tpu.dot_dimension_numbers<[1], [0], [0], [1], [0, 0, 1, 1], [], []>} : vector<256x16xbf16>, vector<16x32xbf16>, vector<256x32xf32> -> vector<256x32xf32>
    %c0_3 = arith.constant 0 : index
    %c0_4 = arith.constant 0 : index
    %3 = vector.load %arg3[%c0_3, %c0_4] : memref<1x32xf32, #tpu.memory_space<vmem>>, vector<1x32xf32>
    %4 = vector.broadcast %3 : vector<1x32xf32> to vector<256x32xf32>
    %5 = arith.addf %2, %4 : vector<256x32xf32>
    %cst_5 = arith.constant 0.000000e+00 : f32
    %6 = vector.broadcast %cst_5 : f32 to vector<256x32xf32>
    %7 = arith.maximumf %5, %6 : vector<256x32xf32>
    %8 = arith.truncf %7 : vector<256x32xf32> to vector<256x32xbf16>
    %c0_6 = arith.constant 0 : index
    %c0_7 = arith.constant 0 : index
    %9 = vector.load %arg4[%c0_6, %c0_7] : memref<32x64xbf16, #tpu.memory_space<vmem>>, vector<32x64xbf16>
    %cst_8 = arith.constant dense<0.000000e+00> : vector<256x64xf32>
    %10 = tpu.matmul %8, %9, %cst_8 {dimension_numbers = #tpu.dot_dimension_numbers<[1], [0], [0], [1], [0, 0, 1, 1], [], []>} : vector<256x32xbf16>, vector<32x64xbf16>, vector<256x64xf32> -> vector<256x64xf32>
    %c0_9 = arith.constant 0 : index
    %c0_10 = arith.constant 0 : index
    %11 = vector.load %arg5[%c0_9, %c0_10] : memref<1x64xf32, #tpu.memory_space<vmem>>, vector<1x64xf32>
    %12 = vector.broadcast %11 : vector<1x64xf32> to vector<256x64xf32>
    %13 = arith.addf %10, %12 : vector<256x64xf32>
    %cst_11 = arith.constant 0.000000e+00 : f32
    %14 = vector.broadcast %cst_11 : f32 to vector<256x64xf32>
    %15 = arith.maximumf %13, %14 : vector<256x64xf32>
    %16 = arith.truncf %15 : vector<256x64xf32> to vector<256x64xbf16>
    %c0_12 = arith.constant 0 : index
    %c0_13 = arith.constant 0 : index
    %17 = vector.load %arg6[%c0_12, %c0_13] : memref<64x32xbf16, #tpu.memory_space<vmem>>, vector<64x32xbf16>
    %cst_14 = arith.constant dense<0.000000e+00> : vector<256x32xf32>
    %18 = tpu.matmul %16, %17, %cst_14 {dimension_numbers = #tpu.dot_dimension_numbers<[1], [0], [0], [1], [0, 0, 1, 1], [], []>} : vector<256x64xbf16>, vector<64x32xbf16>, vector<256x32xf32> -> vector<256x32xf32>
    %c0_15 = arith.constant 0 : index
    %c0_16 = arith.constant 0 : index
    %19 = vector.load %arg7[%c0_15, %c0_16] : memref<1x32xf32, #tpu.memory_space<vmem>>, vector<1x32xf32>
    %20 = vector.broadcast %19 : vector<1x32xf32> to vector<256x32xf32>
    %21 = arith.addf %18, %20 : vector<256x32xf32>
    %cst_17 = arith.constant 0.000000e+00 : f32
    %22 = vector.broadcast %cst_17 : f32 to vector<256x32xf32>
    %23 = arith.maximumf %21, %22 : vector<256x32xf32>
    %24 = arith.truncf %23 : vector<256x32xf32> to vector<256x32xbf16>
    %c0_18 = arith.constant 0 : index
    %c0_19 = arith.constant 0 : index
    %25 = vector.load %arg8[%c0_18, %c0_19] : memref<32x16xbf16, #tpu.memory_space<vmem>>, vector<32x16xbf16>
    %cst_20 = arith.constant dense<0.000000e+00> : vector<256x16xf32>
    %26 = tpu.matmul %24, %25, %cst_20 {dimension_numbers = #tpu.dot_dimension_numbers<[1], [0], [0], [1], [0, 0, 1, 1], [], []>} : vector<256x32xbf16>, vector<32x16xbf16>, vector<256x16xf32> -> vector<256x16xf32>
    %c0_21 = arith.constant 0 : index
    %c0_22 = arith.constant 0 : index
    %27 = vector.load %arg9[%c0_21, %c0_22] : memref<1x16xf32, #tpu.memory_space<vmem>>, vector<1x16xf32>
    %28 = vector.broadcast %27 : vector<1x16xf32> to vector<256x16xf32>
    %29 = arith.addf %26, %28 : vector<256x16xf32>
    %cst_23 = arith.constant 0.000000e+00 : f32
    %30 = vector.broadcast %cst_23 : f32 to vector<256x16xf32>
    %31 = arith.maximumf %29, %30 : vector<256x16xf32>
    %32 = arith.truncf %31 : vector<256x16xf32> to vector<256x16xbf16>
    %c0_24 = arith.constant 0 : index
    %c0_25 = arith.constant 0 : index
    %33 = vector.load %arg10[%c0_24, %c0_25] : memref<16x128xbf16, #tpu.memory_space<vmem>>, vector<16x128xbf16>
    %cst_26 = arith.constant dense<0.000000e+00> : vector<256x128xf32>
    %34 = tpu.matmul %32, %33, %cst_26 {dimension_numbers = #tpu.dot_dimension_numbers<[1], [0], [0], [1], [0, 0, 1, 1], [], []>} : vector<256x16xbf16>, vector<16x128xbf16>, vector<256x128xf32> -> vector<256x128xf32>
    %c0_27 = arith.constant 0 : index
    %c0_28 = arith.constant 0 : index
    %35 = vector.load %arg11[%c0_27, %c0_28] : memref<1x128xf32, #tpu.memory_space<vmem>>, vector<1x128xf32>
    %36 = vector.broadcast %35 : vector<1x128xf32> to vector<256x128xf32>
    %37 = arith.addf %34, %36 : vector<256x128xf32>
    %c0_29 = arith.constant 0 : index
    %c0_30 = arith.constant 0 : index
    %38 = vector.load %arg12[%c0_29, %c0_30] : memref<256x128xf32, #tpu.memory_space<vmem>>, vector<256x128xf32>
    tpu.vector_store %arg12[%c0_29, %c0_30], %37 {strides = array<i32>} : memref<256x128xf32, #tpu.memory_space<vmem>>, vector<256x128xf32>,
    return
  }
  func.func @transform_0(%arg0: i32) -> (i32, i32) {
    %c0_i32 = arith.constant 0 : i32
    %c0_i32_0 = arith.constant 0 : i32
    return %arg0, %c0_i32 : i32, i32
  }
  func.func @transform_1(%arg0: i32) -> (i32, i32) {
    %c0_i32 = arith.constant 0 : i32
    %c0_i32_0 = arith.constant 0 : i32
    %c0_i32_1 = arith.constant 0 : i32
    return %c0_i32, %c0_i32_0 : i32, i32
  }
  func.func @transform_2(%arg0: i32) -> (i32, i32) {
    %c0_i32 = arith.constant 0 : i32
    %c0_i32_0 = arith.constant 0 : i32
    %c0_i32_1 = arith.constant 0 : i32
    return %c0_i32, %c0_i32_0 : i32, i32
  }
  func.func @transform_3(%arg0: i32) -> (i32, i32) {
    %c0_i32 = arith.constant 0 : i32
    %c0_i32_0 = arith.constant 0 : i32
    %c0_i32_1 = arith.constant 0 : i32
    return %c0_i32, %c0_i32_0 : i32, i32
  }
  func.func @transform_4(%arg0: i32) -> (i32, i32) {
    %c0_i32 = arith.constant 0 : i32
    %c0_i32_0 = arith.constant 0 : i32
    %c0_i32_1 = arith.constant 0 : i32
    return %c0_i32, %c0_i32_0 : i32, i32
  }
  func.func @transform_5(%arg0: i32) -> (i32, i32) {
    %c0_i32 = arith.constant 0 : i32
    %c0_i32_0 = arith.constant 0 : i32
    %c0_i32_1 = arith.constant 0 : i32
    return %c0_i32, %c0_i32_0 : i32, i32
  }
  func.func @transform_6(%arg0: i32) -> (i32, i32) {
    %c0_i32 = arith.constant 0 : i32
    %c0_i32_0 = arith.constant 0 : i32
    %c0_i32_1 = arith.constant 0 : i32
    return %c0_i32, %c0_i32_0 : i32, i32
  }
  func.func @transform_7(%arg0: i32) -> (i32, i32) {
    %c0_i32 = arith.constant 0 : i32
    %c0_i32_0 = arith.constant 0 : i32
    %c0_i32_1 = arith.constant 0 : i32
    return %c0_i32, %c0_i32_0 : i32, i32
  }
  func.func @transform_8(%arg0: i32) -> (i32, i32) {
    %c0_i32 = arith.constant 0 : i32
    %c0_i32_0 = arith.constant 0 : i32
    %c0_i32_1 = arith.constant 0 : i32
    return %c0_i32, %c0_i32_0 : i32, i32
  }
  func.func @transform_9(%arg0: i32) -> (i32, i32) {
    %c0_i32 = arith.constant 0 : i32
    %c0_i32_0 = arith.constant 0 : i32
    %c0_i32_1 = arith.constant 0 : i32
    return %c0_i32, %c0_i32_0 : i32, i32
  }
  func.func @transform_10(%arg0: i32) -> (i32, i32) {
    %c0_i32 = arith.constant 0 : i32
    %c0_i32_0 = arith.constant 0 : i32
    %c0_i32_1 = arith.constant 0 : i32
    return %c0_i32, %c0_i32_0 : i32, i32
  }
  func.func @transform_11(%arg0: i32) -> (i32, i32) {
    %c0_i32 = arith.constant 0 : i32
    %c0_i32_0 = arith.constant 0 : i32
    return %arg0, %c0_i32 : i32, i32
  }
}

</mosaic_0001>

<bundles_post_ra>
// kernel: mlp_forward.1
= control target key start
LH: loop header
LB: loop body
LE: loop exit
PB: predicated region body
PF: predicated region fallthrough
CT: control target
= control target key end

     0   :  { %s2442_s17 = smov 0   ;;  %s2816_s0 = inlined_call_operand.vmem [shape: bf16[512,16], index: 0, kind: input, shape index: {}]   ;;  %s2817_s1 = inlined_call_operand.vmem [shape: bf16[16,32], index: 1, kind: input, shape index: {}]   ;;  %s2818_s2 = inlined_call_operand.vmem [shape: f32[1,32], index: 2, kind: input, shape index: {}]   ;;  %s2819_s3 = inlined_call_operand.vmem [shape: bf16[32,64], index: 3, kind: input, shape index: {}]   ;;  %s2820_s4 = inlined_call_operand.vmem [shape: f32[1,64], index: 4, kind: input, shape index: {}]   ;;  %s2821_s5 = inlined_call_operand.vmem [shape: bf16[64,32], index: 5, kind: input, shape index: {}]   ;;  %s2822_s6 = inlined_call_operand.vmem [shape: f32[1,32], index: 6, kind: input, shape index: {}]   ;;  %s2823_s7 = inlined_call_operand.vmem [shape: bf16[32,16], index: 7, kind: input, shape index: {}]   ;;  %s2824_s8 = inlined_call_operand.vmem [shape: f32[1,16], index: 8, kind: input, shape index: {}]   ;;  %s2825_s9 = inlined_call_operand.vmem [shape: bf16[16,128], index: 9, kind: input, shape index: {}]   ;;  %s2826_s10 = inlined_call_operand.vmem [shape: f32[1,128], index: 10, kind: input, shape index: {}]   ;;  %s2827_s11 = inlined_call_operand.vmem [shape: f32[512,128], index: 11, kind: output, shape index: {}]  }
   0x1 LB: > { %s1946_s18 = sadd.s32 4294967295, %s2380_s17   ;;  %p1950_p0 = scmp.ge.s32.totalorder %s2380_s17, 1  ;;  %s2380_s17 = sphi %s2442_s17, %s21_s17  }
   0x2   : > { %p338_p1 = scmp.lt.s32.totalorder %s2380_s17, 3 }
   0x4   : > { %p339_p2 = pnand %p1950_p0, %p338_p1 }
   0x5   : > { %v2348_v0 = vld [vmem:[%s2817_s1] sm:$0xff] (!%p339_p2)   ;;  %s1951_s21 = sshll.u32 (!%p339_p2), %s1946_s18, 5  ;;  %vm518_vm0 = vcmask (!%p339_p2), 130048   ;;  %v2366_v8 = vld [vmem:[%s2819_s3 + $0x8] sm:$0xff] (!%p339_p2)   ;;  %v2369_v21 = vld [vmem:[%s2821_s5 + $0x10] sm:$0xff] (!%p339_p2)   ;;  %vm799_vm1 = vcmask (!%p339_p2), 261120  }
   0x6   : > { %342 = sbr.rel (%p339_p2) target bundleno = 1180 (0x49c), region = 64  ;;  %p379_p3 = scmp.lt.s32.totalorder (!%p339_p2), %s1951_s21, 63  ;;  %2158 = vmatprep.subr.bf16.mxu0 (!%p339_p2), %v2348_v0  ;;  %2338 = vmatprep.subr.bf16.mxu1 (!%p339_p2), %v2348_v0  ;;  %v2365_v1 = vld [vmem:[%s2819_s3] sm:$0xff] (!%p339_p2)   ;;  %v2368_v20 = vld [vmem:[%s2821_s5 + $0x8] sm:$0xff] (!%p339_p2)   ;;  %vm1096_vm2 = vcmask (!%p339_p2), 523264  }
   0x7   : > { %2159 = vmatpush3.bf16.msra.mxu0 (!%p339_p2), %v2348_v0  ;;  %2339 = vmatpush3.bf16.msra.mxu1 (!%p339_p2), %v2348_v0  ;;  %v2367_v19 = vld [vmem:[%s2821_s5] sm:$0xff] (!%p339_p2)  }
   0x8   : > { %2192 = vmatprep.subr.bf16.mxu1 (!%p339_p2), %v2365_v1  ;;  %2228 = vmatprep.subr.bf16.mxu0 (!%p339_p2), %v2367_v19  ;;  %v2511_v22 = vld [vmem:[%s2818_s2] ss:$0 sm:$0xff] (!%p339_p2) }
   0xd   : > { %s2829_s21 = smov (!%p379_p3, %s1951_s21), 63 }
   0xe   : > { %s1952_s24 = sshll.u32 %s2829_s21, 2  ;;  %s1954_s16 = sshll.u32 %s2829_s21, 3 }
   0xf   : > { %s2462_s27 = scalar_lea.vmem %s2816_s0, %s1952_s24  ;;  %s2747_s23 = scalar_lea.vmem %s2827_s11, %s1954_s16 }
  0x10   : > { %v2349_v2 = vld [vmem:[%s2462_s27] sm:$0xff]   ;;  %v2350_v3 = vld [vmem:[%s2462_s27 + $0x8] sm:$0xff]   ;;  %v2351_v4 = vld [vmem:[%s2462_s27 + $0x10] sm:$0xff]  }
  0x11   : > { %2160 = vmatprep.mubr.msk.bf16.mxu0 %vm518_vm0, %v2349_v2  ;;  %v2352_v5 = vld [vmem:[%s2462_s27 + $0x18] sm:$0xff]   ;;  %v2353_v6 = vld [vmem:[%s2462_s27 + $0x20] sm:$0xff]   ;;  %v2358_v9 = vld [vmem:[%s2462_s27 + $0x48] sm:$0xff]  }
  0x12   : > { %2161 = vmatmul.mubr.msk.bf16.vlgmr.msra.gmra.mrb[0].mxu0 %vm518_vm0, %v2350_v3  ;;  %v2357_v7 = vld [vmem:[%s2462_s27 + $0x40] sm:$0xff]   ;;  %v2359_v10 = vld [vmem:[%s2462_s27 + $0x50] sm:$0xff]   ;;  %v2354_v11 = vld [vmem:[%s2462_s27 + $0x28] sm:$0xff]  }
  0x13   : > { %2164 = vmatprep.mubr.msk.bf16.mxu0 %vm518_vm0, %v2351_v4  ;;  %2176 = vmatprep.mubr.msk.bf16.mxu1 %vm518_vm0, %v2357_v7  ;;  %v2355_v12 = vld [vmem:[%s2462_s27 + $0x30] sm:$0xff]   ;;  %v2360_v13 = vld [vmem:[%s2462_s27 + $0x58] sm:$0xff]   ;;  %v2361_v14 = vld [vmem:[%s2462_s27 + $0x60] sm:$0xff]  }
  0x14   : > { %2177 = vmatmul.mubr.msk.bf16.vlgmr.msra.gmra.mrb[0].mxu1 %vm518_vm0, %v2358_v9  ;;  %v2356_v15 = vld [vmem:[%s2462_s27 + $0x38] sm:$0xff]   ;;  %v2362_v16 = vld [vmem:[%s2462_s27 + $0x68] sm:$0xff]   ;;  %v2363_v17 = vld [vmem:[%s2462_s27 + $0x70] sm:$0xff]   ;;  %2229 = vmatpush3.bf16.msra.mxu0 %v2367_v19 }
  0x15   : > { %2180 = vmatprep.mubr.msk.bf16.mxu1 %vm518_vm0, %v2359_v10  ;;  %2193 = vmatpush3.bf16.msra.mxu1 %v2365_v1  ;;  %v2364_v18 = vld [vmem:[%s2462_s27 + $0x78] sm:$0xff]  }
  0x16   : > { %2194 = vmatprep.subr.bf16.mxu1 %v2366_v8  ;;  %2230 = vmatprep.subr.bf16.mxu0 %v2368_v20 }
  0x18   : > { %2231 = vmatpush3.bf16.msra.mxu0 %v2368_v20 }
  0x19   : > { %2195 = vmatpush3.bf16.msra.mxu1 %v2366_v8  ;;  %2232 = vmatprep.subr.bf16.mxu0 %v2369_v21 }
  0x1a   : > { %2165 = vmatmul.mubr.msk.bf16.gmra.mrb[4].mxu0 %vm518_vm0, %v2352_v5 }
  0x1b   : > { %2168 = vmatprep.mubr.msk.bf16.mxu0 %vm518_vm0, %v2353_v6 }
  0x1c   : > { %2181 = vmatmul.mubr.msk.bf16.gmra.mrb[4].mxu1 %vm518_vm0, %v2360_v13  ;;  %2233 = vmatpush3.bf16.msra.mxu0 %v2369_v21 }
  0x1d   : > { %2184 = vmatprep.mubr.msk.bf16.mxu1 %vm518_vm0, %v2361_v14 }
  0x22   : > { %2169 = vmatmul.mubr.msk.bf16.gmra.mrb[8].mxu0 %vm518_vm0, %v2354_v11 }
  0x23   : > { %2172 = vmatprep.mubr.msk.bf16.mxu0 %vm518_vm0, %v2355_v12 }
  0x24   : > { %2185 = vmatmul.mubr.msk.bf16.gmra.mrb[8].mxu1 %vm518_vm0, %v2362_v16 }
  0x25   : > { %2188 = vmatprep.mubr.msk.bf16.mxu1 %vm518_vm0, %v2363_v17 }
  0x2a   : > { %2173 = vmatmul.mubr.msk.bf16.gmra.mrb[12].mxu0 %vm518_vm0, %v2356_v15 }
  0x2c   : > { %2189 = vmatmul.mubr.msk.bf16.gmra.mrb[12].mxu1 %vm518_vm0, %v2364_v18 }
  0xe5   : > { %v2162_v23 = vpop.f32.mrb[0].mxu0 }
  0xe6   : > { %v610_v24 = vadd.f32 %v2162_v23, %v2511_v22  ;;  %v601_v25 = vpop.f32.mrb[1].mxu0 }
  0xe7   : > { %v602_v26 = vadd.f32 %v2511_v22, %v601_v25  ;;  %v2163_v27 = vpop.f32.mrb[2].mxu0  ;;  %v2178_v38 = vpop.f32.mrb[0].mxu1 }
  0xe8   : > { %v613_v28 = vadd.f32 %v2163_v27, %v2511_v22  ;;  %v604_v29 = vpop.f32.mrb[3].mxu0  ;;  %v730_v31 = vmax.f32 %v610_v24, 0.0  ;;  %v674_v41 = vadd.f32 %v2178_v38, %v2511_v22  ;;  %v665_v42 = vpop.f32.mrb[1].mxu1 }
  0xe9   : > { %v605_v30 = vadd.f32 %v2511_v22, %v604_v29  ;;  %v728_v33 = vmax.f32 %v602_v26, 0.0  ;;  %v666_v45 = vadd.f32 %v2511_v22, %v665_v42  ;;  %v2179_v46 = vpop.f32.mrb[2].mxu1 }
  0xea   : > { %v731_v32 = vmax.f32 %v613_v28, 0.0  ;;  %v746_v49 = vmax.f32 %v674_v41, 0.0  ;;  %v677_v50 = vadd.f32 %v2179_v46, %v2511_v22  ;;  %v668_v51 = vpop.f32.mrb[3].mxu1 }
  0xeb   : > { %v729_v34 = vmax.f32 %v605_v30, 0.0  ;;  %v744_v53 = vmax.f32 %v666_v45, 0.0  ;;  %v669_v54 = vadd.f32 %v2511_v22, %v668_v51 }
  0xec   : > { %v761_v35 = vpack.c.bf16 %v731_v32, %v730_v31  ;;  %v747_v57 = vmax.f32 %v677_v50, 0.0 }
  0xed   : > { %v760_v36 = vpack.c.bf16 %v729_v34, %v728_v33  ;;  %v2166_v37 = vpop.f32.mrb[4].mxu0  ;;  %v745_v60 = vmax.f32 %v669_v54, 0.0 }
  0xee   : > { %v626_v39 = vadd.f32 %v2166_v37, %v2511_v22  ;;  %v617_v40 = vpop.f32.mrb[5].mxu0  ;;  %v2527_v62 = vpack.c.bf16 %v747_v57, %v746_v49 }
  0xef   : > { %v618_v43 = vadd.f32 %v2511_v22, %v617_v40  ;;  %v2167_v44 = vpop.f32.mrb[6].mxu0  ;;  %2196 = vmatprep.mubr.msk.bf16.mxu1 %vm799_vm1, %v760_v36  ;;  %v2529_v1 = vpack.c.bf16 %v745_v60, %v744_v53  ;;  %v2182_v2 = vpop.f32.mrb[4].mxu1 }
  0xf0   : > { %v629_v47 = vadd.f32 %v2167_v44, %v2511_v22  ;;  %v620_v48 = vpop.f32.mrb[7].mxu0  ;;  %2197 = vmatmul.mubr.msk.bf16.vlgmr.msra.gmra.mrb[16].mxu1 %vm799_vm1, %v761_v35  ;;  %v734_v55 = vmax.f32 %v626_v39, 0.0  ;;  %v690_v5 = vadd.f32 %v2182_v2, %v2511_v22  ;;  %v681_v6 = vpop.f32.mrb[5].mxu1 }
  0xf1   : > { %v621_v52 = vadd.f32 %v2511_v22, %v620_v48  ;;  %v732_v58 = vmax.f32 %v618_v43, 0.0  ;;  %v682_v9 = vadd.f32 %v2511_v22, %v681_v6  ;;  %v2183_v10 = vpop.f32.mrb[6].mxu1 }
  0xf2   : > { %v735_v56 = vmax.f32 %v629_v47, 0.0  ;;  %v750_v13 = vmax.f32 %v690_v5, 0.0  ;;  %v693_v14 = vadd.f32 %v2183_v10, %v2511_v22  ;;  %v684_v15 = vpop.f32.mrb[7].mxu1  ;;  %v2579_v10 = vld [vmem:[%s2820_s4] ss:$0 sm:$0xff] }
  0xf3   : > { %v733_v59 = vmax.f32 %v621_v52, 0.0  ;;  %v748_v17 = vmax.f32 %v682_v9, 0.0  ;;  %v685_v18 = vadd.f32 %v2511_v22, %v684_v15 }
  0xf4   : > { %v763_v61 = vpack.c.bf16 %v735_v56, %v734_v55  ;;  %v751_v21 = vmax.f32 %v693_v14, 0.0 }
  0xf5   : > { %v762_v63 = vpack.c.bf16 %v733_v59, %v732_v58  ;;  %v2170_v0 = vpop.f32.mrb[8].mxu0  ;;  %v749_v25 = vmax.f32 %v685_v18, 0.0 }
  0xf6   : > { %v642_v3 = vadd.f32 %v2170_v0, %v2511_v22  ;;  %v633_v4 = vpop.f32.mrb[9].mxu0  ;;  %v771_v27 = vpack.c.bf16 %v751_v21, %v750_v13 }
  0xf7   : > { %v634_v7 = vadd.f32 %v2511_v22, %v633_v4  ;;  %v2171_v8 = vpop.f32.mrb[10].mxu0  ;;  %2200 = vmatprep.mubr.msk.bf16.mxu1 %vm799_vm1, %v762_v63  ;;  %v770_v30 = vpack.c.bf16 %v749_v25, %v748_v17  ;;  %v2186_v31 = vpop.f32.mrb[8].mxu1 }
  0xf8   : > { %v645_v11 = vadd.f32 %v2171_v8, %v2511_v22  ;;  %v636_v12 = vpop.f32.mrb[11].mxu0  ;;  %2201 = vmatmul.mubr.msk.bf16.gmra.mrb[20].mxu1 %vm799_vm1, %v763_v61  ;;  %v738_v19 = vmax.f32 %v642_v3, 0.0  ;;  %v706_v34 = vadd.f32 %v2186_v31, %v2511_v22  ;;  %v697_v35 = vpop.f32.mrb[9].mxu1 }
  0xf9   : > { %v637_v16 = vadd.f32 %v2511_v22, %v636_v12  ;;  %v736_v23 = vmax.f32 %v634_v7, 0.0  ;;  %v698_v38 = vadd.f32 %v2511_v22, %v697_v35  ;;  %v2187_v39 = vpop.f32.mrb[10].mxu1 }
  0xfa   : > { %v739_v20 = vmax.f32 %v645_v11, 0.0  ;;  %v754_v42 = vmax.f32 %v706_v34, 0.0  ;;  %v709_v43 = vadd.f32 %v2187_v39, %v2511_v22  ;;  %v700_v44 = vpop.f32.mrb[11].mxu1 }
  0xfb   : > { %v737_v24 = vmax.f32 %v637_v16, 0.0  ;;  %v752_v46 = vmax.f32 %v698_v38, 0.0  ;;  %v701_v47 = vadd.f32 %v2511_v22, %v700_v44 }
  0xfc   : > { %v765_v26 = vpack.c.bf16 %v739_v20, %v738_v19  ;;  %v755_v50 = vmax.f32 %v709_v43, 0.0 }
  0xfd   : > { %v764_v28 = vpack.c.bf16 %v737_v24, %v736_v23  ;;  %v2174_v29 = vpop.f32.mrb[12].mxu0  ;;  %v753_v53 = vmax.f32 %v701_v47, 0.0 }
  0xfe   : > { %v658_v32 = vadd.f32 %v2174_v29, %v2511_v22  ;;  %v649_v33 = vpop.f32.mrb[13].mxu0  ;;  %v773_v55 = vpack.c.bf16 %v755_v50, %v754_v42 }
  0xff   : > { %v650_v36 = vadd.f32 %v2511_v22, %v649_v33  ;;  %v2175_v37 = vpop.f32.mrb[14].mxu0  ;;  %2204 = vmatprep.mubr.msk.bf16.mxu1 %vm799_vm1, %v764_v28  ;;  %v772_v57 = vpack.c.bf16 %v753_v53, %v752_v46  ;;  %v2190_v58 = vpop.f32.mrb[12].mxu1 }
 0x100   : > { %v661_v40 = vadd.f32 %v2175_v37, %v2511_v22  ;;  %v652_v41 = vpop.f32.mrb[15].mxu0  ;;  %2205 = vmatmul.mubr.msk.bf16.gmra.mrb[24].mxu1 %vm799_vm1, %v765_v26  ;;  %v742_v48 = vmax.f32 %v658_v32, 0.0  ;;  %v722_v59 = vadd.f32 %v2190_v58, %v2511_v22  ;;  %v713_v60 = vpop.f32.mrb[13].mxu1 }
 0x101   : > { %v653_v45 = vadd.f32 %v2511_v22, %v652_v41  ;;  %v740_v51 = vmax.f32 %v650_v36, 0.0  ;;  %v714_v61 = vadd.f32 %v2511_v22, %v713_v60  ;;  %v2191_v63 = vpop.f32.mrb[14].mxu1 }
 0x102   : > { %v743_v49 = vmax.f32 %v661_v40, 0.0  ;;  %v758_v0 = vmax.f32 %v722_v59, 0.0  ;;  %v725_v2 = vadd.f32 %v2191_v63, %v2511_v22  ;;  %v716_v3 = vpop.f32.mrb[15].mxu1 }
 0x103   : > { %v741_v52 = vmax.f32 %v653_v45, 0.0  ;;  %v756_v4 = vmax.f32 %v714_v61, 0.0  ;;  %v717_v5 = vadd.f32 %v2511_v22, %v716_v3  ;;  %v2370_v22 = vld [vmem:[%s2821_s5 + $0x18] sm:$0xff]  }
 0x104   : > { %v767_v54 = vpack.c.bf16 %v743_v49, %v742_v48  ;;  %v759_v6 = vmax.f32 %v725_v2, 0.0  ;;  %2234 = vmatprep.subr.bf16.mxu0 %v2370_v22 }
 0x105   : > { %v766_v56 = vpack.c.bf16 %v741_v52, %v740_v51  ;;  %v757_v7 = vmax.f32 %v717_v5, 0.0  ;;  %2235 = vmatpush3.bf16.msra.mxu0 %v2370_v22 }
 0x106   : > { %v775_v8 = vpack.c.bf16 %v759_v6, %v758_v0 }
 0x107   : > { %2208 = vmatprep.mubr.msk.bf16.mxu1 %vm799_vm1, %v766_v56  ;;  %v774_v9 = vpack.c.bf16 %v757_v7, %v756_v4 }
 0x108   : > { %2209 = vmatmul.mubr.msk.bf16.gmra.mrb[28].mxu1 %vm799_vm1, %v767_v54 }
 0x109   : > { %2212 = vmatprep.mubr.msk.bf16.mxu1 %vm799_vm1, %v2529_v1  ;;  %v2372_v1 = vld [vmem:[%s2823_s7 + $0x8] sm:$0xff]  }
 0x110   : > { %2213 = vmatmul.mubr.msk.bf16.gmra.mrb[32].mxu1 %vm799_vm1, %v2527_v62  ;;  %v2371_v62 = vld [vmem:[%s2823_s7] sm:$0xff]  }
 0x111   : > { %2216 = vmatprep.mubr.msk.bf16.mxu1 %vm799_vm1, %v770_v30  ;;  %2268 = vmatprep.subr.bf16.mxu1 %v2371_v62 }
 0x112   : > { %2269 = vmatpush3.bf16.msra.mxu1 %v2371_v62 }
 0x113   : > { %2270 = vmatprep.subr.bf16.mxu1 %v2372_v1 }
 0x116   : > { %2271 = vmatpush3.bf16.msra.mxu1 %v2372_v1 }
 0x118   : > { %2217 = vmatmul.mubr.msk.bf16.gmra.mrb[36].mxu1 %vm799_vm1, %v771_v27 }
 0x119   : > { %2220 = vmatprep.mubr.msk.bf16.mxu1 %vm799_vm1, %v772_v57 }
 0x120   : > { %2221 = vmatmul.mubr.msk.bf16.gmra.mrb[40].mxu1 %vm799_vm1, %v773_v55 }
 0x121   : > { %2224 = vmatprep.mubr.msk.bf16.mxu1 %vm799_vm1, %v774_v9 }
 0x128   : > { %2225 = vmatmul.mubr.msk.bf16.gmra.mrb[44].mxu1 %vm799_vm1, %v775_v8 }
 0x1c3   : > { %v2198_v11 = vpop.f32.mrb[16].mxu1 }
 0x1c4   : > { %v891_v12 = vadd.f32 %v2198_v11, %v2579_v10  ;;  %v882_v13 = vpop.f32.mrb[17].mxu1 }
 0x1c5   : > { %v883_v14 = vadd.f32 %v2579_v10, %v882_v13  ;;  %v2199_v15 = vpop.f32.mrb[18].mxu1 }
 0x1c6   : > { %v894_v16 = vadd.f32 %v2199_v15, %v2579_v10  ;;  %v885_v17 = vpop.f32.mrb[19].mxu1  ;;  %v1011_v19 = vmax.f32 %v891_v12, 0.0 }
 0x1c7   : > { %v886_v18 = vadd.f32 %v2579_v10, %v885_v17  ;;  %v1009_v21 = vmax.f32 %v883_v14, 0.0 }
 0x1c8   : > { %v1012_v20 = vmax.f32 %v894_v16, 0.0 }
 0x1c9   : > { %v1010_v23 = vmax.f32 %v886_v18, 0.0 }
 0x1ca   : > { %v1042_v24 = vpack.c.bf16 %v1012_v20, %v1011_v19 }
 0x1cb   : > { %v1041_v25 = vpack.c.bf16 %v1010_v23, %v1009_v21  ;;  %v2202_v26 = vpop.f32.mrb[20].mxu1 }
 0x1cc   : > { %v907_v27 = vadd.f32 %v2202_v26, %v2579_v10  ;;  %v898_v28 = vpop.f32.mrb[21].mxu1 }
 0x1cd   : > { %v899_v29 = vadd.f32 %v2579_v10, %v898_v28  ;;  %v2203_v30 = vpop.f32.mrb[22].mxu1  ;;  %2236 = vmatprep.mubr.msk.bf16.mxu0 %vm1096_vm2, %v1041_v25 }
 0x1ce   : > { %v910_v31 = vadd.f32 %v2203_v30, %v2579_v10  ;;  %v901_v32 = vpop.f32.mrb[23].mxu1  ;;  %2237 = vmatmul.mubr.msk.bf16.vlgmr.msra.gmra.mrb[16].mxu0 %vm1096_vm2, %v1042_v24  ;;  %v1015_v34 = vmax.f32 %v907_v27, 0.0 }
 0x1cf   : > { %v902_v33 = vadd.f32 %v2579_v10, %v901_v32  ;;  %v1013_v36 = vmax.f32 %v899_v29, 0.0 }
 0x1d0   : > { %v1016_v35 = vmax.f32 %v910_v31, 0.0 }
 0x1d1   : > { %v1014_v37 = vmax.f32 %v902_v33, 0.0 }
 0x1d2   : > { %v1044_v38 = vpack.c.bf16 %v1016_v35, %v1015_v34 }
 0x1d3   : > { %v1043_v39 = vpack.c.bf16 %v1014_v37, %v1013_v36  ;;  %v2206_v40 = vpop.f32.mrb[24].mxu1 }
 0x1d4   : > { %v923_v41 = vadd.f32 %v2206_v40, %v2579_v10  ;;  %v914_v42 = vpop.f32.mrb[25].mxu1 }
 0x1d5   : > { %v915_v43 = vadd.f32 %v2579_v10, %v914_v42  ;;  %v2207_v44 = vpop.f32.mrb[26].mxu1  ;;  %2240 = vmatprep.mubr.msk.bf16.mxu0 %vm1096_vm2, %v1043_v39 }
 0x1d6   : > { %v926_v45 = vadd.f32 %v2207_v44, %v2579_v10  ;;  %v917_v46 = vpop.f32.mrb[27].mxu1  ;;  %2241 = vmatmul.mubr.msk.bf16.gmra.mrb[20].mxu0 %vm1096_vm2, %v1044_v38  ;;  %v1019_v48 = vmax.f32 %v923_v41, 0.0 }
 0x1d7   : > { %v918_v47 = vadd.f32 %v2579_v10, %v917_v46  ;;  %v1017_v50 = vmax.f32 %v915_v43, 0.0 }
 0x1d8   : > { %v1020_v49 = vmax.f32 %v926_v45, 0.0 }
 0x1d9   : > { %v1018_v51 = vmax.f32 %v918_v47, 0.0 }
 0x1da   : > { %v1046_v52 = vpack.c.bf16 %v1020_v49, %v1019_v48 }
 0x1db   : > { %v1045_v53 = vpack.c.bf16 %v1018_v51, %v1017_v50  ;;  %v2210_v54 = vpop.f32.mrb[28].mxu1 }
 0x1dc   : > { %v939_v55 = vadd.f32 %v2210_v54, %v2579_v10  ;;  %v930_v56 = vpop.f32.mrb[29].mxu1 }
 0x1dd   : > { %v931_v57 = vadd.f32 %v2579_v10, %v930_v56  ;;  %v2211_v58 = vpop.f32.mrb[30].mxu1  ;;  %2244 = vmatprep.mubr.msk.bf16.mxu0 %vm1096_vm2, %v1045_v53 }
 0x1de   : > { %v942_v59 = vadd.f32 %v2211_v58, %v2579_v10  ;;  %v933_v60 = vpop.f32.mrb[31].mxu1  ;;  %2245 = vmatmul.mubr.msk.bf16.gmra.mrb[24].mxu0 %vm1096_vm2, %v1046_v52  ;;  %v1023_v63 = vmax.f32 %v939_v55, 0.0 }
 0x1df   : > { %v934_v61 = vadd.f32 %v2579_v10, %v933_v60  ;;  %v1021_v2 = vmax.f32 %v931_v57, 0.0 }
 0x1e0   : > { %v1024_v0 = vmax.f32 %v942_v59, 0.0 }
 0x1e1   : > { %v1022_v3 = vmax.f32 %v934_v61, 0.0  ;;  %v2373_v61 = vld [vmem:[%s2825_s9] sm:$0xff]  }
 0x1e2   : > { %v1048_v4 = vpack.c.bf16 %v1024_v0, %v1023_v63  ;;  %2304 = vmatprep.subr.bf16.mxu0 %v2373_v61 }
 0x1e3   : > { %v1047_v5 = vpack.c.bf16 %v1022_v3, %v1021_v2  ;;  %v2214_v6 = vpop.f32.mrb[32].mxu1  ;;  %2305 = vmatpush3.bf16.msra.mxu0 %v2373_v61 }
 0x1e4   : > { %v955_v7 = vadd.f32 %v2214_v6, %v2579_v10  ;;  %v946_v8 = vpop.f32.mrb[33].mxu1 }
 0x1e5   : > { %v947_v9 = vadd.f32 %v2579_v10, %v946_v8  ;;  %v2215_v22 = vpop.f32.mrb[34].mxu1  ;;  %2248 = vmatprep.mubr.msk.bf16.mxu0 %vm1096_vm2, %v1047_v5 }
 0x1e6   : > { %v958_v62 = vadd.f32 %v2215_v22, %v2579_v10  ;;  %v949_v1 = vpop.f32.mrb[35].mxu1  ;;  %2249 = vmatmul.mubr.msk.bf16.gmra.mrb[28].mxu0 %vm1096_vm2, %v1048_v4  ;;  %v1027_v12 = vmax.f32 %v955_v7, 0.0 }
 0x1e7   : > { %v950_v11 = vadd.f32 %v2579_v10, %v949_v1  ;;  %v1025_v14 = vmax.f32 %v947_v9, 0.0 }
 0x1e8   : > { %v1028_v13 = vmax.f32 %v958_v62, 0.0 }
 0x1e9   : > { %v1026_v15 = vmax.f32 %v950_v11, 0.0 }
 0x1ea   : > { %v1050_v16 = vpack.c.bf16 %v1028_v13, %v1027_v12 }
 0x1eb   : > { %v1049_v17 = vpack.c.bf16 %v1026_v15, %v1025_v14  ;;  %v2218_v18 = vpop.f32.mrb[36].mxu1 }
 0x1ec   : > { %v971_v19 = vadd.f32 %v2218_v18, %v2579_v10  ;;  %v962_v20 = vpop.f32.mrb[37].mxu1 }
 0x1ed   : > { %v963_v21 = vadd.f32 %v2579_v10, %v962_v20  ;;  %v2219_v23 = vpop.f32.mrb[38].mxu1  ;;  %2252 = vmatprep.mubr.msk.bf16.mxu0 %vm1096_vm2, %v1049_v17 }
 0x1ee   : > { %v974_v24 = vadd.f32 %v2219_v23, %v2579_v10  ;;  %v965_v25 = vpop.f32.mrb[39].mxu1  ;;  %2253 = vmatmul.mubr.msk.bf16.gmra.mrb[32].mxu0 %vm1096_vm2, %v1050_v16  ;;  %v1031_v27 = vmax.f32 %v971_v19, 0.0 }
 0x1ef   : > { %v966_v26 = vadd.f32 %v2579_v10, %v965_v25  ;;  %v1029_v29 = vmax.f32 %v963_v21, 0.0 }
 0x1f0   : > { %v1032_v28 = vmax.f32 %v974_v24, 0.0 }
 0x1f1   : > { %v1030_v30 = vmax.f32 %v966_v26, 0.0 }
 0x1f2   : > { %v1052_v31 = vpack.c.bf16 %v1032_v28, %v1031_v27 }
 0x1f3   : > { %v1051_v32 = vpack.c.bf16 %v1030_v30, %v1029_v29  ;;  %v2222_v33 = vpop.f32.mrb[40].mxu1 }
 0x1f4   : > { %v987_v34 = vadd.f32 %v2222_v33, %v2579_v10  ;;  %v978_v35 = vpop.f32.mrb[41].mxu1 }
 0x1f5   : > { %v979_v36 = vadd.f32 %v2579_v10, %v978_v35  ;;  %v2223_v37 = vpop.f32.mrb[42].mxu1  ;;  %2256 = vmatprep.mubr.msk.bf16.mxu0 %vm1096_vm2, %v1051_v32 }
 0x1f6   : > { %v990_v38 = vadd.f32 %v2223_v37, %v2579_v10  ;;  %v981_v39 = vpop.f32.mrb[43].mxu1  ;;  %2257 = vmatmul.mubr.msk.bf16.gmra.mrb[36].mxu0 %vm1096_vm2, %v1052_v31  ;;  %v1035_v41 = vmax.f32 %v987_v34, 0.0 }
 0x1f7   : > { %v982_v40 = vadd.f32 %v2579_v10, %v981_v39  ;;  %v1033_v43 = vmax.f32 %v979_v36, 0.0 }
 0x1f8   : > { %v1036_v42 = vmax.f32 %v990_v38, 0.0 }
 0x1f9   : > { %v1034_v44 = vmax.f32 %v982_v40, 0.0 }
 0x1fa   : > { %v1054_v45 = vpack.c.bf16 %v1036_v42, %v1035_v41 }
 0x1fb   : > { %v1053_v46 = vpack.c.bf16 %v1034_v44, %v1033_v43  ;;  %v2226_v47 = vpop.f32.mrb[44].mxu1 }
 0x1fc   : > { %v1003_v48 = vadd.f32 %v2226_v47, %v2579_v10  ;;  %v994_v49 = vpop.f32.mrb[45].mxu1 }
 0x1fd   : > { %v995_v50 = vadd.f32 %v2579_v10, %v994_v49  ;;  %v2227_v51 = vpop.f32.mrb[46].mxu1  ;;  %2260 = vmatprep.mubr.msk.bf16.mxu0 %vm1096_vm2, %v1053_v46 }
 0x1fe   : > { %v1006_v52 = vadd.f32 %v2227_v51, %v2579_v10  ;;  %v997_v53 = vpop.f32.mrb[47].mxu1  ;;  %2261 = vmatmul.mubr.msk.bf16.gmra.mrb[40].mxu0 %vm1096_vm2, %v1054_v45  ;;  %v1039_v55 = vmax.f32 %v1003_v48, 0.0 }
 0x1ff   : > { %v998_v54 = vadd.f32 %v2579_v10, %v997_v53  ;;  %v1037_v57 = vmax.f32 %v995_v50, 0.0  ;;  %v2635_v10 = vld [vmem:[%s2822_s6] ss:$0 sm:$0xff] }
 0x200   : > { %v1040_v56 = vmax.f32 %v1006_v52, 0.0 }
 0x201   : > { %v1038_v58 = vmax.f32 %v998_v54, 0.0 }
 0x202   : > { %v1056_v59 = vpack.c.bf16 %v1040_v56, %v1039_v55 }
 0x203   : > { %v1055_v60 = vpack.c.bf16 %v1038_v58, %v1037_v57 }
 0x205   : > { %2264 = vmatprep.mubr.msk.bf16.mxu0 %vm1096_vm2, %v1055_v60 }
 0x206   : > { %2265 = vmatmul.mubr.msk.bf16.gmra.mrb[44].mxu0 %vm1096_vm2, %v1056_v59 }
 0x2a1   : > { %v2238_v63 = vpop.f32.mrb[16].mxu0 }
 0x2a2   : > { %v1188_v0 = vadd.f32 %v2238_v63, %v2635_v10  ;;  %v1179_v2 = vpop.f32.mrb[17].mxu0 }
 0x2a3   : > { %v1180_v3 = vadd.f32 %v2635_v10, %v1179_v2  ;;  %v2239_v4 = vpop.f32.mrb[18].mxu0 }
 0x2a4   : > { %v1191_v5 = vadd.f32 %v2239_v4, %v2635_v10  ;;  %v1182_v6 = vpop.f32.mrb[19].mxu0  ;;  %v1308_v8 = vmax.f32 %v1188_v0, 0.0 }
 0x2a5   : > { %v1183_v7 = vadd.f32 %v2635_v10, %v1182_v6  ;;  %v1306_v22 = vmax.f32 %v1180_v3, 0.0 }
 0x2a6   : > { %v1309_v9 = vmax.f32 %v1191_v5, 0.0 }
 0x2a7   : > { %v1307_v62 = vmax.f32 %v1183_v7, 0.0 }
 0x2a8   : > { %v1339_v1 = vpack.c.bf16 %v1309_v9, %v1308_v8 }
 0x2a9   : > { %v1338_v11 = vpack.c.bf16 %v1307_v62, %v1306_v22  ;;  %v2242_v12 = vpop.f32.mrb[20].mxu0 }
 0x2aa   : > { %v1204_v13 = vadd.f32 %v2242_v12, %v2635_v10  ;;  %v1195_v14 = vpop.f32.mrb[21].mxu0 }
 0x2ab   : > { %v1196_v15 = vadd.f32 %v2635_v10, %v1195_v14  ;;  %v2243_v16 = vpop.f32.mrb[22].mxu0  ;;  %2272 = vmatprep.mubr.msk.bf16.mxu1 %vm799_vm1, %v1338_v11 }
 0x2ac   : > { %v1207_v17 = vadd.f32 %v2243_v16, %v2635_v10  ;;  %v1198_v18 = vpop.f32.mrb[23].mxu0  ;;  %2273 = vmatmul.mubr.msk.bf16.vlgmr.msra.gmra.mrb[48].mxu1 %vm799_vm1, %v1339_v1  ;;  %v1312_v20 = vmax.f32 %v1204_v13, 0.0 }
 0x2ad   : > { %v1199_v19 = vadd.f32 %v2635_v10, %v1198_v18  ;;  %v1310_v23 = vmax.f32 %v1196_v15, 0.0 }
 0x2ae   : > { %v1313_v21 = vmax.f32 %v1207_v17, 0.0 }
 0x2af   : > { %v1311_v24 = vmax.f32 %v1199_v19, 0.0 }
 0x2b0   : > { %v1341_v25 = vpack.c.bf16 %v1313_v21, %v1312_v20 }
 0x2b1   : > { %v1340_v26 = vpack.c.bf16 %v1311_v24, %v1310_v23  ;;  %v2246_v27 = vpop.f32.mrb[24].mxu0 }
 0x2b2   : > { %v1220_v28 = vadd.f32 %v2246_v27, %v2635_v10  ;;  %v1211_v29 = vpop.f32.mrb[25].mxu0 }
 0x2b3   : > { %v1212_v30 = vadd.f32 %v2635_v10, %v1211_v29  ;;  %v2247_v31 = vpop.f32.mrb[26].mxu0  ;;  %2276 = vmatprep.mubr.msk.bf16.mxu1 %vm799_vm1, %v1340_v26 }
 0x2b4   : > { %v1223_v32 = vadd.f32 %v2247_v31, %v2635_v10  ;;  %v1214_v33 = vpop.f32.mrb[27].mxu0  ;;  %2277 = vmatmul.mubr.msk.bf16.gmra.mrb[52].mxu1 %vm799_vm1, %v1341_v25  ;;  %v1316_v35 = vmax.f32 %v1220_v28, 0.0 }
 0x2b5   : > { %v1215_v34 = vadd.f32 %v2635_v10, %v1214_v33  ;;  %v1314_v37 = vmax.f32 %v1212_v30, 0.0 }
 0x2b6   : > { %v1317_v36 = vmax.f32 %v1223_v32, 0.0 }
 0x2b7   : > { %v1315_v38 = vmax.f32 %v1215_v34, 0.0 }
 0x2b8   : > { %v1343_v39 = vpack.c.bf16 %v1317_v36, %v1316_v35 }
 0x2b9   : > { %v1342_v40 = vpack.c.bf16 %v1315_v38, %v1314_v37  ;;  %v2250_v41 = vpop.f32.mrb[28].mxu0 }
 0x2ba   : > { %v1236_v42 = vadd.f32 %v2250_v41, %v2635_v10  ;;  %v1227_v43 = vpop.f32.mrb[29].mxu0 }
 0x2bb   : > { %v1228_v44 = vadd.f32 %v2635_v10, %v1227_v43  ;;  %v2251_v45 = vpop.f32.mrb[30].mxu0  ;;  %2280 = vmatprep.mubr.msk.bf16.mxu1 %vm799_vm1, %v1342_v40 }
 0x2bc   : > { %v1239_v46 = vadd.f32 %v2251_v45, %v2635_v10  ;;  %v1230_v47 = vpop.f32.mrb[31].mxu0  ;;  %2281 = vmatmul.mubr.msk.bf16.gmra.mrb[56].mxu1 %vm799_vm1, %v1343_v39  ;;  %v1320_v49 = vmax.f32 %v1236_v42, 0.0 }
 0x2bd   : > { %v1231_v48 = vadd.f32 %v2635_v10, %v1230_v47  ;;  %v1318_v51 = vmax.f32 %v1228_v44, 0.0 }
 0x2be   : > { %v1321_v50 = vmax.f32 %v1239_v46, 0.0 }
 0x2bf   : > { %v1319_v52 = vmax.f32 %v1231_v48, 0.0  ;;  %v2688_v48 = vld [vmem:[%s2824_s8] ss:$0 sm:$0xff] }
 0x2c0   : > { %v1345_v53 = vpack.c.bf16 %v1321_v50, %v1320_v49 }
 0x2c1   : > { %v1344_v54 = vpack.c.bf16 %v1319_v52, %v1318_v51  ;;  %v2254_v55 = vpop.f32.mrb[32].mxu0 }
 0x2c2   : > { %v1252_v56 = vadd.f32 %v2254_v55, %v2635_v10  ;;  %v1243_v57 = vpop.f32.mrb[33].mxu0 }
 0x2c3   : > { %v1244_v58 = vadd.f32 %v2635_v10, %v1243_v57  ;;  %v2255_v59 = vpop.f32.mrb[34].mxu0  ;;  %2284 = vmatprep.mubr.msk.bf16.mxu1 %vm799_vm1, %v1344_v54 }
 0x2c4   : > { %v1255_v60 = vadd.f32 %v2255_v59, %v2635_v10  ;;  %v1246_v61 = vpop.f32.mrb[35].mxu0  ;;  %2285 = vmatmul.mubr.msk.bf16.gmra.mrb[60].mxu1 %vm799_vm1, %v1345_v53  ;;  %v1324_v0 = vmax.f32 %v1252_v56, 0.0 }
 0x2c5   : > { %v1247_v63 = vadd.f32 %v2635_v10, %v1246_v61  ;;  %v1322_v3 = vmax.f32 %v1244_v58, 0.0 }
 0x2c6   : > { %v1325_v2 = vmax.f32 %v1255_v60, 0.0 }
 0x2c7   : > { %v1323_v4 = vmax.f32 %v1247_v63, 0.0 }
 0x2c8   : > { %v1347_v5 = vpack.c.bf16 %v1325_v2, %v1324_v0 }
 0x2c9   : > { %v1346_v6 = vpack.c.bf16 %v1323_v4, %v1322_v3  ;;  %v2258_v7 = vpop.f32.mrb[36].mxu0 }
 0x2ca   : > { %v1268_v8 = vadd.f32 %v2258_v7, %v2635_v10  ;;  %v1259_v9 = vpop.f32.mrb[37].mxu0 }
 0x2cb   : > { %v1260_v22 = vadd.f32 %v2635_v10, %v1259_v9  ;;  %v2259_v62 = vpop.f32.mrb[38].mxu0  ;;  %2288 = vmatprep.mubr.msk.bf16.mxu1 %vm799_vm1, %v1346_v6 }
 0x2cc   : > { %v1271_v1 = vadd.f32 %v2259_v62, %v2635_v10  ;;  %v1262_v11 = vpop.f32.mrb[39].mxu0  ;;  %2289 = vmatmul.mubr.msk.bf16.gmra.mrb[64].mxu1 %vm799_vm1, %v1347_v5  ;;  %v1328_v13 = vmax.f32 %v1268_v8, 0.0 }
 0x2cd   : > { %v1263_v12 = vadd.f32 %v2635_v10, %v1262_v11  ;;  %v1326_v15 = vmax.f32 %v1260_v22, 0.0 }
 0x2ce   : > { %v1329_v14 = vmax.f32 %v1271_v1, 0.0 }
 0x2cf   : > { %v1327_v16 = vmax.f32 %v1263_v12, 0.0 }
 0x2d0   : > { %v1349_v17 = vpack.c.bf16 %v1329_v14, %v1328_v13 }
 0x2d1   : > { %v1348_v18 = vpack.c.bf16 %v1327_v16, %v1326_v15  ;;  %v2262_v19 = vpop.f32.mrb[40].mxu0 }
 0x2d2   : > { %v1284_v20 = vadd.f32 %v2262_v19, %v2635_v10  ;;  %v1275_v21 = vpop.f32.mrb[41].mxu0 }
 0x2d3   : > { %v1276_v23 = vadd.f32 %v2635_v10, %v1275_v21  ;;  %v2263_v24 = vpop.f32.mrb[42].mxu0  ;;  %2292 = vmatprep.mubr.msk.bf16.mxu1 %vm799_vm1, %v1348_v18 }
 0x2d4   : > { %v1287_v25 = vadd.f32 %v2263_v24, %v2635_v10  ;;  %v1278_v26 = vpop.f32.mrb[43].mxu0  ;;  %2293 = vmatmul.mubr.msk.bf16.gmra.mrb[68].mxu1 %vm799_vm1, %v1349_v17  ;;  %v1332_v28 = vmax.f32 %v1284_v20, 0.0 }
 0x2d5   : > { %v1279_v27 = vadd.f32 %v2635_v10, %v1278_v26  ;;  %v1330_v30 = vmax.f32 %v1276_v23, 0.0 }
 0x2d6   : > { %v1333_v29 = vmax.f32 %v1287_v25, 0.0 }
 0x2d7   : > { %v1331_v31 = vmax.f32 %v1279_v27, 0.0 }
 0x2d8   : > { %v1351_v32 = vpack.c.bf16 %v1333_v29, %v1332_v28 }
 0x2d9   : > { %v1350_v33 = vpack.c.bf16 %v1331_v31, %v1330_v30  ;;  %v2266_v34 = vpop.f32.mrb[44].mxu0 }
 0x2da   : > { %v1300_v35 = vadd.f32 %v2266_v34, %v2635_v10  ;;  %v1291_v36 = vpop.f32.mrb[45].mxu0 }
 0x2db   : > { %v1292_v37 = vadd.f32 %v2635_v10, %v1291_v36  ;;  %v2267_v38 = vpop.f32.mrb[46].mxu0  ;;  %2296 = vmatprep.mubr.msk.bf16.mxu1 %vm799_vm1, %v1350_v33 }
 0x2dc   : > { %v1303_v39 = vadd.f32 %v2267_v38, %v2635_v10  ;;  %v1294_v40 = vpop.f32.mrb[47].mxu0  ;;  %2297 = vmatmul.mubr.msk.bf16.gmra.mrb[72].mxu1 %vm799_vm1, %v1351_v32  ;;  %v1336_v42 = vmax.f32 %v1300_v35, 0.0 }
 0x2dd   : > { %v1295_v41 = vadd.f32 %v2635_v10, %v1294_v40  ;;  %v1334_v44 = vmax.f32 %v1292_v37, 0.0 }
 0x2de   : > { %v1337_v43 = vmax.f32 %v1303_v39, 0.0 }
 0x2df   : > { %v1335_v45 = vmax.f32 %v1295_v41, 0.0 }
 0x2e0   : > { %v1353_v46 = vpack.c.bf16 %v1337_v43, %v1336_v42 }
 0x2e1   : > { %v1352_v47 = vpack.c.bf16 %v1335_v45, %v1334_v44 }
 0x2e3   : > { %2300 = vmatprep.mubr.msk.bf16.mxu1 %vm799_vm1, %v1352_v47 }
 0x2e4   : > { %2301 = vmatmul.mubr.msk.bf16.gmra.mrb[76].mxu1 %vm799_vm1, %v1353_v46 }
 0x37f   : > { %v2274_v49 = vpop.f32.mrb[48].mxu1 }
 0x380   : > { %v1468_v50 = vadd.f32 %v2274_v49, %v2688_v48  ;;  %v1459_v51 = vpop.f32.mrb[49].mxu1 }
 0x381   : > { %v1460_v10 = vadd.f32 %v2688_v48, %v1459_v51  ;;  %v2275_v52 = vpop.f32.mrb[50].mxu1 }
 0x382   : > { %v1471_v53 = vadd.f32 %v2275_v52, %v2688_v48  ;;  %v1462_v54 = vpop.f32.mrb[51].mxu1  ;;  %v1588_v56 = vmax.f32 %v1468_v50, 0.0 }
 0x383   : > { %v1463_v55 = vadd.f32 %v2688_v48, %v1462_v54  ;;  %v1586_v58 = vmax.f32 %v1460_v10, 0.0 }
 0x384   : > { %v1589_v57 = vmax.f32 %v1471_v53, 0.0 }
 0x385   : > { %v1587_v59 = vmax.f32 %v1463_v55, 0.0 }
 0x386   : > { %v1619_v60 = vpack.c.bf16 %v1589_v57, %v1588_v56 }
 0x387   : > { %v1618_v61 = vpack.c.bf16 %v1587_v59, %v1586_v58  ;;  %v2278_v63 = vpop.f32.mrb[52].mxu1 }
 0x388   : > { %v1484_v0 = vadd.f32 %v2278_v63, %v2688_v48  ;;  %v1475_v2 = vpop.f32.mrb[53].mxu1 }
 0x389   : > { %v1476_v3 = vadd.f32 %v2688_v48, %v1475_v2  ;;  %v2279_v4 = vpop.f32.mrb[54].mxu1  ;;  %2306 = vmatprep.mubr.msk.bf16.mxu0 %vm518_vm0, %v1618_v61 }
 0x38a   : > { %v1487_v5 = vadd.f32 %v2279_v4, %v2688_v48  ;;  %v1478_v6 = vpop.f32.mrb[55].mxu1  ;;  %2307 = vmatmul.mubr.msk.bf16.vlgmr.msra.gmra.mrb[48].mxu0 %vm518_vm0, %v1619_v60  ;;  %v1592_v8 = vmax.f32 %v1484_v0, 0.0 }
 0x38b   : > { %v1479_v7 = vadd.f32 %v2688_v48, %v1478_v6  ;;  %v1590_v22 = vmax.f32 %v1476_v3, 0.0 }
 0x38c   : > { %v1593_v9 = vmax.f32 %v1487_v5, 0.0 }
 0x38d   : > { %v1591_v62 = vmax.f32 %v1479_v7, 0.0 }
 0x38e   : > { %v1621_v1 = vpack.c.bf16 %v1593_v9, %v1592_v8 }
 0x38f   : > { %v1620_v11 = vpack.c.bf16 %v1591_v62, %v1590_v22  ;;  %v2282_v12 = vpop.f32.mrb[56].mxu1 }
 0x390   : > { %v1500_v13 = vadd.f32 %v2282_v12, %v2688_v48  ;;  %v1491_v14 = vpop.f32.mrb[57].mxu1 }
 0x391   : > { %v1492_v15 = vadd.f32 %v2688_v48, %v1491_v14  ;;  %v2283_v16 = vpop.f32.mrb[58].mxu1  ;;  %2310 = vmatprep.mubr.msk.bf16.mxu0 %vm518_vm0, %v1620_v11 }
 0x392   : > { %v1503_v17 = vadd.f32 %v2283_v16, %v2688_v48  ;;  %v1494_v18 = vpop.f32.mrb[59].mxu1  ;;  %2311 = vmatmul.mubr.msk.bf16.gmra.mrb[52].mxu0 %vm518_vm0, %v1621_v1  ;;  %v1596_v20 = vmax.f32 %v1500_v13, 0.0 }
 0x393   : > { %v1495_v19 = vadd.f32 %v2688_v48, %v1494_v18  ;;  %v1594_v23 = vmax.f32 %v1492_v15, 0.0 }
 0x394   : > { %v1597_v21 = vmax.f32 %v1503_v17, 0.0 }
 0x395   : > { %v1595_v24 = vmax.f32 %v1495_v19, 0.0 }
 0x396   : > { %v1623_v25 = vpack.c.bf16 %v1597_v21, %v1596_v20 }
 0x397   : > { %v1622_v26 = vpack.c.bf16 %v1595_v24, %v1594_v23  ;;  %v2286_v27 = vpop.f32.mrb[60].mxu1 }
 0x398   : > { %v1516_v28 = vadd.f32 %v2286_v27, %v2688_v48  ;;  %v1507_v29 = vpop.f32.mrb[61].mxu1 }
 0x399   : > { %v1508_v30 = vadd.f32 %v2688_v48, %v1507_v29  ;;  %v2287_v31 = vpop.f32.mrb[62].mxu1  ;;  %2314 = vmatprep.mubr.msk.bf16.mxu0 %vm518_vm0, %v1622_v26 }
 0x39a   : > { %v1519_v32 = vadd.f32 %v2287_v31, %v2688_v48  ;;  %v1510_v33 = vpop.f32.mrb[63].mxu1  ;;  %2315 = vmatmul.mubr.msk.bf16.gmra.mrb[56].mxu0 %vm518_vm0, %v1623_v25  ;;  %v1600_v35 = vmax.f32 %v1516_v28, 0.0 }
 0x39b   : > { %v1511_v34 = vadd.f32 %v2688_v48, %v1510_v33  ;;  %v1598_v37 = vmax.f32 %v1508_v30, 0.0 }
 0x39c   : > { %v1601_v36 = vmax.f32 %v1519_v32, 0.0 }
 0x39d   : > { %v1599_v38 = vmax.f32 %v1511_v34, 0.0  ;;  %v2742_v34 = vld [vmem:[%s2826_s10] ss:$0 sm:$0xff] }
 0x39e   : > { %v1625_v39 = vpack.c.bf16 %v1601_v36, %v1600_v35 }
 0x39f   : > { %v1624_v40 = vpack.c.bf16 %v1599_v38, %v1598_v37  ;;  %v2290_v41 = vpop.f32.mrb[64].mxu1 }
 0x3a0   : > { %v1532_v42 = vadd.f32 %v2290_v41, %v2688_v48  ;;  %v1523_v43 = vpop.f32.mrb[65].mxu1 }
 0x3a1   : > { %v1524_v44 = vadd.f32 %v2688_v48, %v1523_v43  ;;  %v2291_v45 = vpop.f32.mrb[66].mxu1  ;;  %2318 = vmatprep.mubr.msk.bf16.mxu0 %vm518_vm0, %v1624_v40 }
 0x3a2   : > { %v1535_v46 = vadd.f32 %v2291_v45, %v2688_v48  ;;  %v1526_v47 = vpop.f32.mrb[67].mxu1  ;;  %2319 = vmatmul.mubr.msk.bf16.gmra.mrb[60].mxu0 %vm518_vm0, %v1625_v39  ;;  %v1604_v50 = vmax.f32 %v1532_v42, 0.0 }
 0x3a3   : > { %v1527_v49 = vadd.f32 %v2688_v48, %v1526_v47  ;;  %v1602_v10 = vmax.f32 %v1524_v44, 0.0 }
 0x3a4   : > { %v1605_v51 = vmax.f32 %v1535_v46, 0.0 }
 0x3a5   : > { %v1603_v52 = vmax.f32 %v1527_v49, 0.0 }
 0x3a6   : > { %v1627_v53 = vpack.c.bf16 %v1605_v51, %v1604_v50 }
 0x3a7   : > { %v1626_v54 = vpack.c.bf16 %v1603_v52, %v1602_v10  ;;  %v2294_v55 = vpop.f32.mrb[68].mxu1 }
 0x3a8   : > { %v1548_v56 = vadd.f32 %v2294_v55, %v2688_v48  ;;  %v1539_v57 = vpop.f32.mrb[69].mxu1 }
 0x3a9   : > { %v1540_v58 = vadd.f32 %v2688_v48, %v1539_v57  ;;  %v2295_v59 = vpop.f32.mrb[70].mxu1  ;;  %2322 = vmatprep.mubr.msk.bf16.mxu0 %vm518_vm0, %v1626_v54 }
 0x3aa   : > { %v1551_v60 = vadd.f32 %v2295_v59, %v2688_v48  ;;  %v1542_v61 = vpop.f32.mrb[71].mxu1  ;;  %2323 = vmatmul.mubr.msk.bf16.gmra.mrb[64].mxu0 %vm518_vm0, %v1627_v53  ;;  %v1608_v0 = vmax.f32 %v1548_v56, 0.0 }
 0x3ab   : > { %v1543_v63 = vadd.f32 %v2688_v48, %v1542_v61  ;;  %v1606_v3 = vmax.f32 %v1540_v58, 0.0 }
 0x3ac   : > { %v1609_v2 = vmax.f32 %v1551_v60, 0.0 }
 0x3ad   : > { %v1607_v4 = vmax.f32 %v1543_v63, 0.0 }
 0x3ae   : > { %v1629_v5 = vpack.c.bf16 %v1609_v2, %v1608_v0 }
 0x3af   : > { %v1628_v6 = vpack.c.bf16 %v1607_v4, %v1606_v3  ;;  %v2298_v7 = vpop.f32.mrb[72].mxu1 }
 0x3b0   : > { %v1564_v8 = vadd.f32 %v2298_v7, %v2688_v48  ;;  %v1555_v9 = vpop.f32.mrb[73].mxu1 }
 0x3b1   : > { %v1556_v22 = vadd.f32 %v2688_v48, %v1555_v9  ;;  %v2299_v62 = vpop.f32.mrb[74].mxu1  ;;  %2326 = vmatprep.mubr.msk.bf16.mxu0 %vm518_vm0, %v1628_v6 }
 0x3b2   : > { %v1567_v1 = vadd.f32 %v2299_v62, %v2688_v48  ;;  %v1558_v11 = vpop.f32.mrb[75].mxu1  ;;  %2327 = vmatmul.mubr.msk.bf16.gmra.mrb[68].mxu0 %vm518_vm0, %v1629_v5  ;;  %v1612_v13 = vmax.f32 %v1564_v8, 0.0 }
 0x3b3   : > { %v1559_v12 = vadd.f32 %v2688_v48, %v1558_v11  ;;  %v1610_v15 = vmax.f32 %v1556_v22, 0.0 }
 0x3b4   : > { %v1613_v14 = vmax.f32 %v1567_v1, 0.0 }
 0x3b5   : > { %v1611_v16 = vmax.f32 %v1559_v12, 0.0 }
 0x3b6   : > { %v1631_v17 = vpack.c.bf16 %v1613_v14, %v1612_v13 }
 0x3b7   : > { %v1630_v18 = vpack.c.bf16 %v1611_v16, %v1610_v15  ;;  %v2302_v19 = vpop.f32.mrb[76].mxu1 }
 0x3b8   : > { %v1580_v20 = vadd.f32 %v2302_v19, %v2688_v48  ;;  %v1571_v21 = vpop.f32.mrb[77].mxu1 }
 0x3b9   : > { %v1572_v23 = vadd.f32 %v2688_v48, %v1571_v21  ;;  %v2303_v24 = vpop.f32.mrb[78].mxu1  ;;  %2330 = vmatprep.mubr.msk.bf16.mxu0 %vm518_vm0, %v1630_v18 }
 0x3ba   : > { %v1583_v25 = vadd.f32 %v2303_v24, %v2688_v48  ;;  %v1574_v26 = vpop.f32.mrb[79].mxu1  ;;  %2331 = vmatmul.mubr.msk.bf16.gmra.mrb[72].mxu0 %vm518_vm0, %v1631_v17  ;;  %v1616_v28 = vmax.f32 %v1580_v20, 0.0 }
 0x3bb   : > { %v1575_v27 = vadd.f32 %v2688_v48, %v1574_v26  ;;  %v1614_v30 = vmax.f32 %v1572_v23, 0.0 }
 0x3bc   : > { %v1617_v29 = vmax.f32 %v1583_v25, 0.0 }
 0x3bd   : > { %v1615_v31 = vmax.f32 %v1575_v27, 0.0 }
 0x3be   : > { %v1633_v32 = vpack.c.bf16 %v1617_v29, %v1616_v28 }
 0x3bf   : > { %v1632_v33 = vpack.c.bf16 %v1615_v31, %v1614_v30 }
 0x3c1   : > { %2334 = vmatprep.mubr.msk.bf16.mxu0 %vm518_vm0, %v1632_v33 }
 0x3c2   : > { %2335 = vmatmul.mubr.msk.bf16.gmra.mrb[76].mxu0 %vm518_vm0, %v1633_v32 }
 0x45d   : > { %v2308_v48 = vpop.f32.mrb[48].mxu0 }
 0x45e   : > { %v1740_v35 = vadd.f32 %v2308_v48, %v2742_v34  ;;  %v1731_v36 = vpop.f32.mrb[49].mxu0 }
 0x45f   : > { %v1732_v37 = vadd.f32 %v2742_v34, %v1731_v36  ;;  %v2309_v38 = vpop.f32.mrb[50].mxu0 }
 0x460   : > { %1860 = vst [vmem:[%s2747_s23 + $0x10] sm:$0xff] %v1740_v35  ;;  %v1743_v39 = vadd.f32 %v2309_v38, %v2742_v34  ;;  %v1734_v40 = vpop.f32.mrb[51].mxu0 }
 0x461   : > { %1858 = vst [vmem:[%s2747_s23] sm:$0xff] %v1732_v37  ;;  %v1735_v41 = vadd.f32 %v2742_v34, %v1734_v40 }
 0x462   : > { %1861 = vst [vmem:[%s2747_s23 + $0x18] sm:$0xff] %v1743_v39 }
 0x463   : > { %1859 = vst [vmem:[%s2747_s23 + $0x8] sm:$0xff] %v1735_v41 }
 0x465   : > { %v2312_v42 = vpop.f32.mrb[52].mxu0 }
 0x466   : > { %v1756_v43 = vadd.f32 %v2312_v42, %v2742_v34  ;;  %v1747_v44 = vpop.f32.mrb[53].mxu0 }
 0x467   : > { %v1748_v45 = vadd.f32 %v2742_v34, %v1747_v44  ;;  %v2313_v46 = vpop.f32.mrb[54].mxu0 }
 0x468   : > { %1864 = vst [vmem:[%s2747_s23 + $0x30] sm:$0xff] %v1756_v43  ;;  %v1759_v47 = vadd.f32 %v2313_v46, %v2742_v34  ;;  %v1750_v49 = vpop.f32.mrb[55].mxu0 }
 0x469   : > { %1862 = vst [vmem:[%s2747_s23 + $0x20] sm:$0xff] %v1748_v45  ;;  %v1751_v50 = vadd.f32 %v2742_v34, %v1750_v49 }
 0x46a   : > { %1865 = vst [vmem:[%s2747_s23 + $0x38] sm:$0xff] %v1759_v47 }
 0x46b   : > { %1863 = vst [vmem:[%s2747_s23 + $0x28] sm:$0xff] %v1751_v50 }
 0x46d   : > { %v2316_v51 = vpop.f32.mrb[56].mxu0 }
 0x46e   : > { %v1772_v10 = vadd.f32 %v2316_v51, %v2742_v34  ;;  %v1763_v52 = vpop.f32.mrb[57].mxu0 }
 0x46f   : > { %v1764_v53 = vadd.f32 %v2742_v34, %v1763_v52  ;;  %v2317_v54 = vpop.f32.mrb[58].mxu0 }
 0x470   : > { %1868 = vst [vmem:[%s2747_s23 + $0x50] sm:$0xff] %v1772_v10  ;;  %v1775_v55 = vadd.f32 %v2317_v54, %v2742_v34  ;;  %v1766_v56 = vpop.f32.mrb[59].mxu0 }
 0x471   : > { %1866 = vst [vmem:[%s2747_s23 + $0x40] sm:$0xff] %v1764_v53  ;;  %v1767_v57 = vadd.f32 %v2742_v34, %v1766_v56 }
 0x472   : > { %1869 = vst [vmem:[%s2747_s23 + $0x58] sm:$0xff] %v1775_v55 }
 0x473   : > { %1867 = vst [vmem:[%s2747_s23 + $0x48] sm:$0xff] %v1767_v57 }
 0x475   : > { %v2320_v58 = vpop.f32.mrb[60].mxu0 }
 0x476   : > { %v1788_v59 = vadd.f32 %v2320_v58, %v2742_v34  ;;  %v1779_v60 = vpop.f32.mrb[61].mxu0 }
 0x477   : > { %v1780_v61 = vadd.f32 %v2742_v34, %v1779_v60  ;;  %v2321_v63 = vpop.f32.mrb[62].mxu0 }
 0x478   : > { %1872 = vst [vmem:[%s2747_s23 + $0x70] sm:$0xff] %v1788_v59  ;;  %v1791_v0 = vadd.f32 %v2321_v63, %v2742_v34  ;;  %v1782_v2 = vpop.f32.mrb[63].mxu0 }
 0x479   : > { %1870 = vst [vmem:[%s2747_s23 + $0x60] sm:$0xff] %v1780_v61  ;;  %v1783_v3 = vadd.f32 %v2742_v34, %v1782_v2 }
 0x47a   : > { %1873 = vst [vmem:[%s2747_s23 + $0x78] sm:$0xff] %v1791_v0 }
 0x47b   : > { %1871 = vst [vmem:[%s2747_s23 + $0x68] sm:$0xff] %v1783_v3 }
 0x47d   : > { %v2324_v4 = vpop.f32.mrb[64].mxu0 }
 0x47e   : > { %v1804_v5 = vadd.f32 %v2324_v4, %v2742_v34  ;;  %v1795_v6 = vpop.f32.mrb[65].mxu0 }
 0x47f   : > { %v1796_v7 = vadd.f32 %v2742_v34, %v1795_v6  ;;  %v2325_v8 = vpop.f32.mrb[66].mxu0 }
 0x480   : > { %1876 = vst [vmem:[%s2747_s23 + $0x90] sm:$0xff] %v1804_v5  ;;  %v1807_v9 = vadd.f32 %v2325_v8, %v2742_v34  ;;  %v1798_v22 = vpop.f32.mrb[67].mxu0 }
 0x481   : > { %1874 = vst [vmem:[%s2747_s23 + $0x80] sm:$0xff] %v1796_v7  ;;  %v1799_v62 = vadd.f32 %v2742_v34, %v1798_v22 }
 0x482   : > { %1877 = vst [vmem:[%s2747_s23 + $0x98] sm:$0xff] %v1807_v9 }
 0x483   : > { %1875 = vst [vmem:[%s2747_s23 + $0x88] sm:$0xff] %v1799_v62 }
 0x485   : > { %v2328_v1 = vpop.f32.mrb[68].mxu0 }
 0x486   : > { %v1820_v11 = vadd.f32 %v2328_v1, %v2742_v34  ;;  %v1811_v12 = vpop.f32.mrb[69].mxu0 }
 0x487   : > { %v1812_v13 = vadd.f32 %v2742_v34, %v1811_v12  ;;  %v2329_v14 = vpop.f32.mrb[70].mxu0 }
 0x488   : > { %1880 = vst [vmem:[%s2747_s23 + $0xb0] sm:$0xff] %v1820_v11  ;;  %v1823_v15 = vadd.f32 %v2329_v14, %v2742_v34  ;;  %v1814_v16 = vpop.f32.mrb[71].mxu0 }
 0x489   : > { %1878 = vst [vmem:[%s2747_s23 + $0xa0] sm:$0xff] %v1812_v13  ;;  %v1815_v17 = vadd.f32 %v2742_v34, %v1814_v16 }
 0x48a   : > { %1881 = vst [vmem:[%s2747_s23 + $0xb8] sm:$0xff] %v1823_v15 }
 0x48b   : > { %1879 = vst [vmem:[%s2747_s23 + $0xa8] sm:$0xff] %v1815_v17 }
 0x48d   : > { %v2332_v18 = vpop.f32.mrb[72].mxu0 }
 0x48e   : > { %v1836_v19 = vadd.f32 %v2332_v18, %v2742_v34  ;;  %v1827_v20 = vpop.f32.mrb[73].mxu0 }
 0x48f   : > { %v1828_v21 = vadd.f32 %v2742_v34, %v1827_v20  ;;  %v2333_v23 = vpop.f32.mrb[74].mxu0 }
 0x490   : > { %1884 = vst [vmem:[%s2747_s23 + $0xd0] sm:$0xff] %v1836_v19  ;;  %v1839_v24 = vadd.f32 %v2333_v23, %v2742_v34  ;;  %v1830_v25 = vpop.f32.mrb[75].mxu0 }
 0x491   : > { %1882 = vst [vmem:[%s2747_s23 + $0xc0] sm:$0xff] %v1828_v21  ;;  %v1831_v26 = vadd.f32 %v2742_v34, %v1830_v25 }
 0x492   : > { %1885 = vst [vmem:[%s2747_s23 + $0xd8] sm:$0xff] %v1839_v24 }
 0x493   : > { %1883 = vst [vmem:[%s2747_s23 + $0xc8] sm:$0xff] %v1831_v26 }
 0x495   : > { %v2336_v27 = vpop.f32.mrb[76].mxu0 }
 0x496   : > { %v1852_v28 = vadd.f32 %v2336_v27, %v2742_v34  ;;  %v1843_v29 = vpop.f32.mrb[77].mxu0 }
 0x497   : > { %v1844_v30 = vadd.f32 %v2742_v34, %v1843_v29  ;;  %v2337_v31 = vpop.f32.mrb[78].mxu0 }
 0x498   : > { %1888 = vst [vmem:[%s2747_s23 + $0xf0] sm:$0xff] %v1852_v28  ;;  %v1855_v32 = vadd.f32 %v2337_v31, %v2742_v34  ;;  %v1846_v33 = vpop.f32.mrb[79].mxu0 }
 0x499   : > { %1886 = vst [vmem:[%s2747_s23 + $0xe0] sm:$0xff] %v1844_v30  ;;  %v1847_v48 = vadd.f32 %v2742_v34, %v1846_v33 }
 0x49a   : > { %1889 = vst [vmem:[%s2747_s23 + $0xf8] sm:$0xff] %v1855_v32 }
 0x49b   : > { %1887 = vst [vmem:[%s2747_s23 + $0xe8] sm:$0xff] %v1847_v48 }
 0x49c PF: > { %s21_s17 = sadd.s32 1, %s2380_s17  }
 0x49d   : > { %p18_p4 = scmp.ge.s32.totalorder %s21_s17, 4  }
 0x49f   :  { %20 = sbr.rel (!%p18_p4) target bundleno = 1 (0x1), region = 94 }

</bundles_post_ra>
